<compile_context>
chip_gen: v7x
topology: tpu7x:2x2x1
jax: 0.10.0
libtpu: 0.0.40
codegen_flags: <defaults>
</compile_context>

<pallas_src>
import math

import numpy as np
import jax
import jax.numpy as jnp
from jax.experimental import pallas as pl
from jax.experimental.pallas import tpu as pltpu


# ----------------------------------------------------------------------------
# fused kernel
# ----------------------------------------------------------------------------
def _make_fused_kernel(features, off_scale0, off_shift0, bias_offs, head_b_off,
                       w_row_offs, head_w_off, temp, batch, r_rows):
    """Activation layout: [channels (sublanes), batch*spatial (lanes)].

    Single invocation runs:  BN0+ReLU -> channel-mix layers (later BNs folded in, ReLU
    between) -> 1-channel head -> per-batch masked soft-argmax raw sums.
    """
    n_conv = len(features) - 1
    c0 = features[0]
    c_last = features[-1]
    temp = float(temp)

    def kernel(x_ref, red_ref, vec_ref, w_ref, heat_ref, sums_ref):
        h = x_ref[...].astype(jnp.float32)                       # [C0, L]

        # BatchNorm3d(eval) + ReLU on the raw input (cannot be folded into a conv).
        scale0 = vec_ref[pl.ds(off_scale0, c0), :]               # [C0, 1]
        shift0 = vec_ref[pl.ds(off_shift0, c0), :]               # [C0, 1]
        h = jnp.maximum(h * scale0 + shift0, 0.0)

        # Channel-mixing layers; BN_{l+1} / final BN are folded into these weights at init.
        # TODO(synk): s2cnn SO3Convolution is a Wigner-domain (spectral) convolution with
        #             bandwidth truncation; approximated as pointwise channel mixing.
        for l in range(n_conv):
            cin, cout = features[l], features[l + 1]
            w = w_ref[pl.ds(w_row_offs[l], cout), pl.ds(0, cin)]       # [Cout, Cin] resident
            b = vec_ref[pl.ds(bias_offs[l], cout), :]                  # [Cout, 1]
            # N = batch*spatial lanes (>=128 here) -> clean MXU matmul; keeps the VALU/XLU
            # free and avoids per-column lane broadcasts of a VPU formulation.
            h = jnp.dot(w, h, preferred_element_type=jnp.float32) + b
            if l < n_conv - 1:
                h = jnp.maximum(h, 0.0)                                # ReLU of next block

        # Head projection to a 1-channel SO(3) heat map.
        # TODO(synk): PrimaryCapsuleLayer / ConvolutionalCapsuleLayer / RotationEstimateLayer
        #             come from an external `block` module whose code is unavailable; they are
        #             replaced by a single learned projection to a 1-channel SO(3) heat map.
        wh = w_ref[pl.ds(head_w_off, 1), pl.ds(0, c_last)]             # [1, C_last]
        bh = vec_ref[pl.ds(head_b_off, 1), :]                          # [1, 1]
        heat = jnp.dot(wh, h, preferred_element_type=jnp.float32) + bh  # [1, L]
        heat_ref[...] = heat                                           # lane-dense [1, L] store

        # Soft-argmax statistics.  red_ref rows 4b..4b+3 hold (beta, alpha, gamma, 1) indices
        # already masked to batch b's lane segment, so all 4*B weighted sums are produced by
        # ONE multiply + ONE lane reduction; the divides happen exactly in the wrapper.
        # TODO(synk): SoftArgmax3D's 'Parzen' windowing around the hard argmax is not
        #             reproduced; a plain temperature-softmax soft-argmax is used instead.
        z = heat * temp                                                # [1, L]
        m_lanes = jnp.zeros_like(z)
        for b in range(batch):                                         # static, tiny
            mask = red_ref[pl.ds(4 * b + 3, 1), :]                     # [1, L] 0/1 batch mask
            zb = jnp.where(mask > 0.0, z, -1e30)
            mb = jnp.max(zb, axis=-1, keepdims=True)                   # per-batch max [1, 1]
            m_lanes = m_lanes + mb * mask
        e = jnp.exp(jnp.minimum(z - m_lanes, 0.0))                     # [1, L]
        eb = jnp.broadcast_to(e, (r_rows, e.shape[-1]))                # one sublane broadcast
        sums_ref[...] = jnp.sum(eb * red_ref[...], axis=-1, keepdims=True)   # [r_rows, 1]

    return kernel


# ----------------------------------------------------------------------------
# pallas_call wrapper
# ----------------------------------------------------------------------------
def _fused_lrf_call(x_cl, red_slab, vec_slab, w_slab, kernel):
    C0, L = x_cl.shape
    r_rows = red_slab.shape[0]

    def _tile_bytes(shape):            # padded (8,128) f32 tile footprint of an operand
        r = -(-shape[-2] // 8) * 8
        c = -(-shape[-1] // 128) * 128
        return r * c * 4

    operand_shapes = [x_cl.shape, red_slab.shape, tuple(vec_slab.shape),
                      tuple(w_slab.shape), (1, L), (r_rows, 1)]
    # generous headroom (double-buffering + internal scratch); everything here is a few KB.
    # TODO(synk): for realistic s2cnn sizes (C~100, S~10-30k) add an S grid axis tiled in
    #             multiples of 128 lanes so the block stays well inside v7x's 64 MiB VMEM.
    vmem_limit = int(min(64 << 20, max(4 << 20, 4 * sum(_tile_bytes(s) for s in operand_shapes))))

    return pl.pallas_call(
        kernel,
        out_shape=(jax.ShapeDtypeStruct((1, L), jnp.float32),
                   jax.ShapeDtypeStruct((r_rows, 1), jnp.float32)),
        grid_spec=pltpu.PrefetchScalarGridSpec(
            num_scalar_prefetch=0,
            grid=(1,),                                   # whole batch in one step
            in_specs=[
                pl.BlockSpec((C0, L), lambda i: (0, 0)),           # activations
                pl.BlockSpec((r_rows, L), lambda i: (0, 0)),       # reduction slab
                pl.BlockSpec(tuple(vec_slab.shape), lambda i: (0, 0)),  # packed vectors
                pl.BlockSpec(tuple(w_slab.shape), lambda i: (0, 0)),    # packed weights
            ],
            out_specs=(pl.BlockSpec((1, L), lambda i: (0, 0)),
                       pl.BlockSpec((r_rows, 1), lambda i: (0, 0)))),
        compiler_params=pltpu.CompilerParams(
            # single grid step -> nothing to shard across v7x TensorCores
            dimension_semantics=("arbitrary",),
            vmem_limit_bytes=vmem_limit),
    )(x_cl, red_slab, vec_slab, w_slab)


def rotation_matrices_zyz(alpha, beta, gamma):
    # R = Rz(alpha) @ Ry(beta) @ Rz(gamma)  (s2cnn / SO(3) euler-angle convention)
    ca, sa = jnp.cos(alpha), jnp.sin(alpha)
    cb, sb = jnp.cos(beta), jnp.sin(beta)
    cg, sg = jnp.cos(gamma), jnp.sin(gamma)
    r00 = ca * cb * cg - sa * sg
    r01 = -ca * cb * sg - sa * cg
    r02 = ca * sb
    r10 = sa * cb * cg + ca * sg
    r11 = -sa * cb * sg + ca * cg
    r12 = sa * sb
    r20 = -sb * cg
    r21 = sb * sg
    r22 = cb
    row0 = jnp.stack([r00, r01, r02], axis=-1)
    row1 = jnp.stack([r10, r11, r12], axis=-1)
    row2 = jnp.stack([r20, r21, r22], axis=-1)
    return jnp.stack([row0, row1, row2], axis=-2)


# ----------------------------------------------------------------------------
# LrfLayer (Pallas version)
# ----------------------------------------------------------------------------
class LrfLayerPallas:
    def __init__(self, bandwidths, features, softmax_temp, use_equatorial_grid,
                 caps_bandwidths, caps_features, caps_capsules, caps_use_residual_block,
                 key):
        self.bandwidths = list(bandwidths)
        self.features = list(features)
        self.softmax_temp = float(softmax_temp)
        self.use_equatorial_grid = use_equatorial_grid
        self.caps_bandwidths = caps_bandwidths
        self.caps_features = caps_features
        self.caps_capsules = caps_capsules
        self.caps_use_residual_block = caps_use_residual_block
        eps = 1e-5

        n_conv = len(features) - 1
        self.strides = [max(1, bandwidths[l] // bandwidths[l + 1]) for l in range(n_conv)]

        keys = jax.random.split(key, 4 * n_conv + 4)
        ki = 0
        bn = []
        convs = []
        for l in range(n_conv):
            cin, cout = features[l], features[l + 1]
            # BatchNorm3d parameters (eval semantics: running_mean=0, running_var=1)
            gamma = np.asarray(1.0 + 0.05 * jax.random.normal(keys[ki], (cin,), jnp.float32)); ki += 1
            beta = np.asarray(0.05 * jax.random.normal(keys[ki], (cin,), jnp.float32)); ki += 1
            bn.append((gamma.astype(np.float32), beta.astype(np.float32)))
            # pointwise channel-mixing weight (stand-in for the s2cnn SO3 kernel)
            w = np.asarray(jax.random.normal(keys[ki], (cout, cin), jnp.float32)) / math.sqrt(cin); ki += 1
            convs.append([w.astype(np.float32), np.zeros((cout,), np.float32)])
        gamma_f = np.asarray(1.0 + 0.05 * jax.random.normal(keys[ki], (features[-1],), jnp.float32)); ki += 1
        beta_f = np.asarray(0.05 * jax.random.normal(keys[ki], (features[-1],), jnp.float32)); ki += 1
        head_w = np.asarray(jax.random.normal(keys[ki], (1, features[-1]), jnp.float32)) / math.sqrt(features[-1]); ki += 1
        head_b = np.zeros((1,), np.float32)

        def fold(w, b, gamma, beta):
            # y = BN(conv(x)) with eval stats (mean 0, var 1): fold the affine into the conv.
            s = (gamma / np.sqrt(1.0 + eps)).astype(np.float32)
            return s[:, None] * w, s * b + beta.astype(np.float32)

        for l in range(1, n_conv):                      # BN_l folds forward into conv_{l-1}
            convs[l - 1][0], convs[l - 1][1] = fold(convs[l - 1][0], convs[l - 1][1], *bn[l])
        convs[n_conv - 1][0], convs[n_conv - 1][1] = fold(                   # final BatchNorm3d
            convs[n_conv - 1][0], convs[n_conv - 1][1], gamma_f, beta_f)

        scale0 = (bn[0][0] / np.sqrt(1.0 + eps)).astype(np.float32)          # BN0 stays explicit
        shift0 = bn[0][1].astype(np.float32)

        # ---- pack everything into two VMEM-resident slabs (one BlockSpec each) ----
        vec_rows = [scale0, shift0]
        self.off_scale0 = 0
        self.off_shift0 = features[0]
        off = 2 * features[0]
        self.bias_offs = []
        for l in range(n_conv):
            self.bias_offs.append(off)
            vec_rows.append(convs[l][1])
            off += features[l + 1]
        self.head_b_off = off
        vec_rows.append(head_b)
        off += 1
        self.vec_slab = jnp.asarray(np.concatenate(vec_rows).reshape(-1, 1).astype(np.float32))

        maxc = max(features)
        w_rows = []
        self.w_row_offs = []
        r = 0
        for l in range(n_conv):
            cout, cin = convs[l][0].shape
            wp = np.zeros((cout, maxc), np.float32)
            wp[:, :cin] = convs[l][0]
            w_rows.append(wp)
            self.w_row_offs.append(r)
            r += cout
        hp = np.zeros((1, maxc), np.float32)
        hp[:, :features[-1]] = head_w
        w_rows.append(hp)
        self.head_w_off = r
        self.w_slab = jnp.asarray(np.concatenate(w_rows, axis=0))

    def __call__(self, x):
        # x: [B, features[0], 2b0, 2b0, 2b0]  (NCDHW; D=gamma, H=alpha, W=beta)
        B, C0, dg0, da0, db0 = x.shape

        # All downstream ops are pointwise in the spatial axes, so the per-layer stride
        # subsampling composes into ONE up-front strided gather, fused by XLA with the
        # channel-major relayout below into a single copy pass.
        # TODO(synk): folding this into the kernel DMA needs a minor-axis-strided copy; kept
        #             as one fused XLA copy for robustness.
        dg, da, db = dg0, da0, db0
        ts = 1
        for s in self.strides:
            dg = -(-dg // s); da = -(-da // s); db = -(-db // s); ts *= s
        x_sub = x if ts == 1 else x[:, :, ::ts, ::ts, ::ts]
        x_sub = x_sub[:, :, :dg, :da, :db]
        S = dg * da * db
        L = B * S
        # kernel activation layout: channels on sublanes, batch*spatial on lanes
        x_cl = jnp.transpose(x_sub, (1, 0, 2, 3, 4)).reshape(C0, L).astype(jnp.float32)

        # Reduction slab (jit-time constant): per batch b, rows 4b..4b+3 hold the
        # (beta, alpha, gamma, 1) coordinate rows masked to that batch's lane segment.
        idx = np.arange(S)
        cb = (idx % db).astype(np.float32)
        ca = ((idx // db) % da).astype(np.float32)
        cg = (idx // (db * da)).astype(np.float32)
        r_rows = max(8, -(-(4 * B) // 8) * 8)
        slab = np.zeros((r_rows, L), np.float32)
        for b in range(B):
            sl = slice(b * S, (b + 1) * S)
            slab[4 * b + 0, sl] = cb
            slab[4 * b + 1, sl] = ca
            slab[4 * b + 2, sl] = cg
            slab[4 * b + 3, sl] = 1.0
        red_slab = jnp.asarray(slab)

        kernel = _make_fused_kernel(self.features, self.off_scale0, self.off_shift0,
                                    self.bias_offs, self.head_b_off,
                                    self.w_row_offs, self.head_w_off,
                                    self.softmax_temp, B, r_rows)
        heat, sums = _fused_lrf_call(x_cl, red_slab, self.vec_slab, self.w_slab, kernel)

        lrf_features_map = heat.reshape(B, 1, dg, da, db)   # contiguous reshape, no copy
        sums = sums[: 4 * B, 0].reshape(B, 4)
        coords = sums[:, :3] / sums[:, 3:4]                 # exact divide in the wrapper
        # coords[:,0]=beta idx (dim -1), [:,1]=alpha idx (dim -2), [:,2]=gamma idx (dim -3)

        size_alphas = lrf_features_map.shape[-2]
        size_betas = lrf_features_map.shape[-1]
        size_gammas = lrf_features_map.shape[-3]
        alphas = math.pi * coords[:, 1] / (size_alphas * 0.5)
        betas = math.pi * (2.0 * coords[:, 0] + 1.0) / (4.0 * (size_betas * 0.5))
        gammas = math.pi * coords[:, 2] / (size_gammas * 0.5)
        mat_lrf = rotation_matrices_zyz(alphas, betas, gammas)
        return lrf_features_map, mat_lrf


# ----------------------------------------------------------------------------
# main
# ----------------------------------------------------------------------------
if __name__ == "__main__":
    bandwidths = [4, 2]
    features = [4, 8]
    softmax_temp = 1.0
    caps_bandwidths = [2, 2, 2, 2]
    caps_features = [8, 8, 8, 8]
    caps_capsules = [1, 4, 4, 1]

    layer = LrfLayerPallas(bandwidths, features, softmax_temp, True,
                           caps_bandwidths, caps_features, caps_capsules, False,
                           key=jax.random.PRNGKey(1))

    B = 2
    d0 = 2 * bandwidths[0]
    x = jax.random.normal(jax.random.PRNGKey(0),
                          (B, features[0], d0, d0, d0), jnp.float32)

    fwd = jax.jit(lambda inp: layer(inp))
    lrf_map, mat_lrf = fwd(x)
    jax.block_until_ready((lrf_map, mat_lrf))

    d1 = 2 * bandwidths[-1]
    assert lrf_map.shape == (B, 1, d1, d1, d1), lrf_map.shape
    assert mat_lrf.shape == (B, 3, 3), mat_lrf.shape
    assert bool(jnp.all(jnp.isfinite(lrf_map))) and bool(jnp.all(jnp.isfinite(mat_lrf)))
    print("KERNEL_OK")
</pallas_src>

<mosaic_0001>
module attributes {stable_mosaic.version = 11 : i64} {
  func.func @kernel(%arg0: i32, %arg1: memref<4x128xf32, #tpu.memory_space<vmem>>, %arg2: memref<8x128xf32, #tpu.memory_space<vmem>>, %arg3: memref<17x1xf32, #tpu.memory_space<vmem>>, %arg4: memref<9x8xf32, #tpu.memory_space<vmem>>, %arg5: memref<1x128xf32, #tpu.memory_space<vmem>>, %arg6: memref<8x1xf32, #tpu.memory_space<vmem>>) attributes {dimension_semantics = [#tpu.dimension_semantics<arbitrary>], iteration_bounds = array<i64: 1>, scalar_prefetch = 0 : i64, scratch_operands = 0 : i64, tpu.core_type = #tpu.core_type<tc>, window_params = [{pipeline_mode = #tpu.pipeline_mode<synchronous>, transform_indices = @transform_0, window_bounds = array<i64: 4, 128>}, {pipeline_mode = #tpu.pipeline_mode<synchronous>, transform_indices = @transform_1, window_bounds = array<i64: 8, 128>}, {pipeline_mode = #tpu.pipeline_mode<synchronous>, transform_indices = @transform_2, window_bounds = array<i64: 17, 1>}, {pipeline_mode = #tpu.pipeline_mode<synchronous>, transform_indices = @transform_3, window_bounds = array<i64: 9, 8>}, {pipeline_mode = #tpu.pipeline_mode<synchronous>, transform_indices = @transform_4, window_bounds = array<i64: 1, 128>}, {pipeline_mode = #tpu.pipeline_mode<synchronous>, transform_indices = @transform_5, window_bounds = array<i64: 8, 1>}]} {
    %c0 = arith.constant 0 : index
    %c0_0 = arith.constant 0 : index
    %0 = vector.load %arg1[%c0, %c0_0] : memref<4x128xf32, #tpu.memory_space<vmem>>, vector<4x128xf32>
    %c0_1 = arith.constant 0 : index
    %c0_2 = arith.constant 0 : index
    %1 = vector.load %arg3[%c0_1, %c0_2] : memref<17x1xf32, #tpu.memory_space<vmem>>, vector<4x1xf32>
    %c4 = arith.constant 4 : index
    %c0_3 = arith.constant 0 : index
    %2 = vector.load %arg3[%c4, %c0_3] : memref<17x1xf32, #tpu.memory_space<vmem>>, vector<4x1xf32>
    %3 = vector.broadcast %1 : vector<4x1xf32> to vector<4x128xf32>
    %4 = arith.mulf %0, %3 : vector<4x128xf32>
    %5 = vector.broadcast %2 : vector<4x1xf32> to vector<4x128xf32>
    %6 = arith.addf %4, %5 : vector<4x128xf32>
    %cst = arith.constant 0.000000e+00 : f32
    %7 = vector.broadcast %cst : f32 to vector<4x128xf32>
    %8 = arith.maximumf %6, %7 : vector<4x128xf32>
    %c0_4 = arith.constant 0 : index
    %c0_5 = arith.constant 0 : index
    %9 = vector.load %arg4[%c0_4, %c0_5] : memref<9x8xf32, #tpu.memory_space<vmem>>, vector<8x4xf32>
    %c8 = arith.constant 8 : index
    %c0_6 = arith.constant 0 : index
    %10 = vector.load %arg3[%c8, %c0_6] : memref<17x1xf32, #tpu.memory_space<vmem>>, vector<8x1xf32>
    %cst_7 = arith.constant dense<0.000000e+00> : vector<8x128xf32>
    %11 = tpu.matmul %9, %8, %cst_7 {dimension_numbers = #tpu.dot_dimension_numbers<[1], [0], [0], [1], [0, 0, 1, 1], [], []>} : vector<8x4xf32>, vector<4x128xf32>, vector<8x128xf32> -> vector<8x128xf32>
    %12 = vector.broadcast %10 : vector<8x1xf32> to vector<8x128xf32>
    %13 = arith.addf %11, %12 : vector<8x128xf32>
    %c8_8 = arith.constant 8 : index
    %c0_9 = arith.constant 0 : index
    %14 = vector.load %arg4[%c8_8, %c0_9] : memref<9x8xf32, #tpu.memory_space<vmem>>, vector<1x8xf32>
    %c16 = arith.constant 16 : index
    %c0_10 = arith.constant 0 : index
    %15 = vector.load %arg3[%c16, %c0_10] : memref<17x1xf32, #tpu.memory_space<vmem>>, vector<1x1xf32>
    %cst_11 = arith.constant dense<0.000000e+00> : vector<1x128xf32>
    %16 = tpu.matmul %14, %13, %cst_11 {dimension_numbers = #tpu.dot_dimension_numbers<[1], [0], [0], [1], [0, 0, 1, 1], [], []>} : vector<1x8xf32>, vector<8x128xf32>, vector<1x128xf32> -> vector<1x128xf32>
    %17 = vector.broadcast %15 : vector<1x1xf32> to vector<1x128xf32>
    %18 = arith.addf %16, %17 : vector<1x128xf32>
    %c0_12 = arith.constant 0 : index
    %c0_13 = arith.constant 0 : index
    %19 = vector.load %arg5[%c0_12, %c0_13] : memref<1x128xf32, #tpu.memory_space<vmem>>, vector<1x128xf32>
    tpu.vector_store %arg5[%c0_12, %c0_13], %18 {strides = array<i32>} : memref<1x128xf32, #tpu.memory_space<vmem>>, vector<1x128xf32>,
    %cst_14 = arith.constant 1.000000e+00 : f32
    %20 = vector.broadcast %cst_14 : f32 to vector<1x128xf32>
    %21 = arith.mulf %18, %20 : vector<1x128xf32>
    %cst_15 = arith.constant 0.000000e+00 : f32
    %22 = vector.broadcast %cst_15 : f32 to vector<1x128xf32>
    %c3 = arith.constant 3 : index
    %c0_16 = arith.constant 0 : index
    %23 = vector.load %arg2[%c3, %c0_16] : memref<8x128xf32, #tpu.memory_space<vmem>>, vector<1x128xf32>
    %cst_17 = arith.constant 0.000000e+00 : f32
    %24 = vector.broadcast %cst_17 : f32 to vector<1x128xf32>
    %25 = arith.cmpf ogt, %23, %24 : vector<1x128xf32>
    %cst_18 = arith.constant -1.000000e+30 : f32
    %26 = vector.broadcast %cst_18 : f32 to vector<1x128xf32>
    %27 = arith.select %25, %21, %26 : vector<1x128xi1>, vector<1x128xf32>
    %cst_19 = arith.constant dense<0xFF800000> : vector<1xf32>
    %28 = vector.multi_reduction <maximumf>, %27, %cst_19 [1] : vector<1x128xf32> to vector<1xf32>
    %29 = vector.shape_cast %28 : vector<1xf32> to vector<1x1xf32>
    %30 = vector.broadcast %29 : vector<1x1xf32> to vector<1x128xf32>
    %31 = arith.mulf %30, %23 : vector<1x128xf32>
    %32 = arith.addf %22, %31 : vector<1x128xf32>
    %c7 = arith.constant 7 : index
    %c0_20 = arith.constant 0 : index
    %33 = vector.load %arg2[%c7, %c0_20] : memref<8x128xf32, #tpu.memory_space<vmem>>, vector<1x128xf32>
    %cst_21 = arith.constant 0.000000e+00 : f32
    %34 = vector.broadcast %cst_21 : f32 to vector<1x128xf32>
    %35 = arith.cmpf ogt, %33, %34 : vector<1x128xf32>
    %cst_22 = arith.constant -1.000000e+30 : f32
    %36 = vector.broadcast %cst_22 : f32 to vector<1x128xf32>
    %37 = arith.select %35, %21, %36 : vector<1x128xi1>, vector<1x128xf32>
    %cst_23 = arith.constant dense<0xFF800000> : vector<1xf32>
    %38 = vector.multi_reduction <maximumf>, %37, %cst_23 [1] : vector<1x128xf32> to vector<1xf32>
    %39 = vector.shape_cast %38 : vector<1xf32> to vector<1x1xf32>
    %40 = vector.broadcast %39 : vector<1x1xf32> to vector<1x128xf32>
    %41 = arith.mulf %40, %33 : vector<1x128xf32>
    %42 = arith.addf %32, %41 : vector<1x128xf32>
    %43 = arith.subf %21, %42 : vector<1x128xf32>
    %cst_24 = arith.constant 0.000000e+00 : f32
    %44 = vector.broadcast %cst_24 : f32 to vector<1x128xf32>
    %45 = arith.minimumf %43, %44 : vector<1x128xf32>
    %46 = math.exp %45 : vector<1x128xf32>
    %47 = vector.shape_cast %46 : vector<1x128xf32> to vector<1x128xf32>
    %48 = vector.broadcast %47 : vector<1x128xf32> to vector<8x128xf32>
    %c0_25 = arith.constant 0 : index
    %c0_26 = arith.constant 0 : index
    %49 = vector.load %arg2[%c0_25, %c0_26] : memref<8x128xf32, #tpu.memory_space<vmem>>, vector<8x128xf32>
    %50 = arith.mulf %48, %49 : vector<8x128xf32>
    %cst_27 = arith.constant dense<0.000000e+00> : vector<8xf32>
    %51 = vector.multi_reduction <add>, %50, %cst_27 [1] : vector<8x128xf32> to vector<8xf32>
    %52 = vector.shape_cast %51 : vector<8xf32> to vector<8x1xf32>
    %c0_28 = arith.constant 0 : index
    %c0_29 = arith.constant 0 : index
    %53 = vector.load %arg6[%c0_28, %c0_29] : memref<8x1xf32, #tpu.memory_space<vmem>>, vector<8x1xf32>
    tpu.vector_store %arg6[%c0_28, %c0_29], %52 {strides = array<i32>} : memref<8x1xf32, #tpu.memory_space<vmem>>, vector<8x1xf32>,
    return
  }
  func.func @transform_0(%arg0: i32) -> (i32, i32) {
    %c0_i32 = arith.constant 0 : i32
    %c0_i32_0 = arith.constant 0 : i32
    %c0_i32_1 = arith.constant 0 : i32
    return %c0_i32, %c0_i32_0 : i32, i32
  }
  func.func @transform_1(%arg0: i32) -> (i32, i32) {
    %c0_i32 = arith.constant 0 : i32
    %c0_i32_0 = arith.constant 0 : i32
    %c0_i32_1 = arith.constant 0 : i32
    return %c0_i32, %c0_i32_0 : i32, i32
  }
  func.func @transform_2(%arg0: i32) -> (i32, i32) {
    %c0_i32 = arith.constant 0 : i32
    %c0_i32_0 = arith.constant 0 : i32
    %c0_i32_1 = arith.constant 0 : i32
    return %c0_i32, %c0_i32_0 : i32, i32
  }
  func.func @transform_3(%arg0: i32) -> (i32, i32) {
    %c0_i32 = arith.constant 0 : i32
    %c0_i32_0 = arith.constant 0 : i32
    %c0_i32_1 = arith.constant 0 : i32
    return %c0_i32, %c0_i32_0 : i32, i32
  }
  func.func @transform_4(%arg0: i32) -> (i32, i32) {
    %c0_i32 = arith.constant 0 : i32
    %c0_i32_0 = arith.constant 0 : i32
    %c0_i32_1 = arith.constant 0 : i32
    return %c0_i32, %c0_i32_0 : i32, i32
  }
  func.func @transform_5(%arg0: i32) -> (i32, i32) {
    %c0_i32 = arith.constant 0 : i32
    %c0_i32_0 = arith.constant 0 : i32
    %c0_i32_1 = arith.constant 0 : i32
    return %c0_i32, %c0_i32_0 : i32, i32
  }
}

</mosaic_0001>

<bundles_post_ra>
// kernel: squeeze.4
= control target key start
LH: loop header
LB: loop body
LE: loop exit
PB: predicated region body
PF: predicated region fallthrough
CT: control target
= control target key end

     0   :  { %vm7_vm0 = vcmask 31744   ;;  %s39_s0 = inlined_call_operand.vmem [shape: f32[8], index: 0, kind: input, shape index: {}]   ;;  %s40_s1 = inlined_call_operand.vmem [shape: f32[2,4], index: 1, kind: output, shape index: {}]  }
   0x1   :  { %v4_v0 = vld [vmem:[%s39_s0] sm:$0x1]  ;;  %s22_s0 = smov 124  }
   0x2   :  { %5 = vst [vmem:[#allocation1] sm:$0x1] %v4_v0 }
   0x9   :  { %v9_v1 = vld [vmem:[#allocation1] sm:$0x1]  }
   0xa   :  { %v6_v2 = vld [vmem:[#allocation1] sm:$0x1]   ;;  %10 = vrot.lane.b32.xlu0 %v9_v1, %s22_s0 }
   0xb   :  { %8 = vst.msk [vmem:[#allocation0] sm:$0x1] %vm7_vm0, %v6_v2  }
  0x7c   :  { %v11_v3 = vpop.permute.xlu0 %10  }
  0x7d   :  { %14 = vst.msk [vmem:[#allocation0 + $0x1] sm:$0x1] %vm7_vm0, %v11_v3  }
  0x84   :  { %v18_v4 = vld [vmem:[#allocation0] sm:$0x3] }
  0x85   :  { %20 = vst [vmem:[%s40_s1] sm:$0x3] %v18_v4 }

// kernel: _lambda_.1
= control target key start
LH: loop header
LB: loop body
LE: loop exit
PB: predicated region body
PF: predicated region fallthrough
CT: control target
= control target key end

     0   :  { %v265_v0 = vmov 0   ;;  %v266_v3 = vmov 0.0   ;;  %vm267_vm0 = vmmov 0   ;;  %vm46_vm1 = vcmask 1043456   ;;  %s334_s2 = inlined_call_operand.vmem [shape: f32[17,1], index: 2, kind: input, shape index: {}]   ;;  %s335_s0 = inlined_call_operand.vmem [shape: f32[4,128], index: 0, kind: input, shape index: {}]   ;;  %s336_s3 = inlined_call_operand.vmem [shape: f32[9,8], index: 3, kind: input, shape index: {}]   ;;  %s337_s1 = inlined_call_operand.vmem [shape: f32[8,128], index: 1, kind: input, shape index: {}]   ;;  %s338_s4 = inlined_call_operand.vmem [shape: f32[1,128], index: 4, kind: output, shape index: {0}]   ;;  %s339_s5 = inlined_call_operand.vmem [shape: f32[8,1], index: 5, kind: output, shape index: {1}]  }
   0x1   :  { %261 = vset.pattern.permute.xlu0 %v265_v0  ;;  %v20_v1 = vld [vmem:[%s334_s2] sm:$0xf]  ;;  %262 = vset.pattern.permute.xlu1 %v265_v0  ;;  %v21_v2 = vld [vmem:[%s334_s2 + $0x4] sm:$0xf]  ;;  %v36_v4 = vld [vmem:[%s334_s2 + $0x8] sm:$0xff]  ;;  %vm42_vm2 = vcmask 31744   ;;  %v223_v36 = vlaneseq }
   0x2   :  { %24 = vperm.xlu0 %261, %v20_v1   ;;  %248 = vmatprep.subr.mxu0 %v266_v3  ;;  %v121_v5 = vld [vmem:[%s334_s2 + $0x10] sm:$0x1]  ;;  %v19_v7 = vld [vmem:[%s335_s0] sm:$0xf]  ;;  %v120_v17 = vld [vmem:[%s336_s3 + $0x8] sm:$0x1] }
   0x3   :  { %253 = vmatprep.subr.mxu1 %v266_v3  ;;  %250 = vmatprep.mubr.msk.f32.mxu0 %vm267_vm0, %v266_v3  ;;  %v35_v12 = vld [vmem:[%s336_s3] sm:$0xff]  ;;  %vm127_vm3 = vcmask 64512   ;;  %vm205_vm6 = vcmask 1040384   ;;  %v224_v37 = vshrl.u32 %v223_v36, 7  ;;  %vm231_vm7 = vcmask 7168  }
   0x4   :  { %255 = vmatprep.mubr.msk.f32.mxu1 %vm267_vm0, %v266_v3  ;;  %39 = vperm.xlu1 %262, %v36_v4   ;;  %v211_v18 = vld [vmem:[%s337_s1 + $0x7] sm:$0x1]  ;;  %v202_v19 = vld [vmem:[%s337_s1 + $0x3] sm:$0x1] }
   0x5   :  { %vm212_vm4 = vcmp.gt.f32.partialorder %v211_v18, 0.0  ;;  %vm203_vm5 = vcmp.gt.f32.partialorder %v202_v19, 0.0  ;;  %v225_v38 = vsub.s32 0, %v224_v37  ;;  %v227_v40 = vld [vmem:[%s337_s1] sm:$0xff] }
   0x6   :  { %30 = vperm.xlu0 %261, %v21_v2  }
   0x8   :  { %124 = vperm.xlu1 %262, %v121_v5  }
  0x81   :  { %v25_v6 = vpop.permute.xlu0 %24 }
  0x82   :  { %v27_v8 = vmul.f32 %v25_v6, %v19_v7 }
  0x83   :  { %v40_v13 = vpop.permute.xlu1 %39 }
  0x85   :  { %v31_v9 = vpop.permute.xlu0 %30 }
  0x86   :  { %v33_v10 = vadd.f32 %v31_v9, %v27_v8 }
  0x87   :  { %v125_v20 = vpop.permute.xlu1 %124 }
  0x88   :  { %v34_v11 = vmax.f32 %v33_v10, 0.0 }
  0x8a   :  { %249 = vmatpush3.msk.msra.mxu0 %vm46_vm1, %v34_v11 }
  0x8b   :  { %251 = vmatmul.mubr.msk.f32.vlgmr.msra.gmra.mrb[0].mxu0 %vm42_vm2, %v35_v12 }
 0x15e   :  { %v116_v14 = vpop.f32.mrb[0].mxu0 }
 0x15f   :  { %v117_v15 = vadd.f32 %v116_v14, %v40_v13  ;;  %v252_v16 = vpop.f32.mrb[1].mxu0 }
 0x161   :  { %254 = vmatpush3.msra.mxu1 %v117_v15 }
 0x162   :  { %256 = vmatmul.mubr.msk.f32.vlgmr.msra.gmra.mrb[0].mxu1 %vm127_vm3, %v120_v17 }
 0x235   :  { %v197_v21 = vpop.f32.mrb[0].mxu1 }
 0x236   :  { %v198_v22 = vadd.f32 %v197_v21, %v125_v20  ;;  %v257_v23 = vpop.f32.mrb[1].mxu1 }
 0x238   :  { %201 = vst [vmem:[%s338_s4] sm:$0x1] %v198_v22  ;;  %v213_v24 = vsel %vm212_vm4, %v198_v22, -1e+30  ;;  %v204_v25 = vsel %vm203_vm5, %v198_v22, -1e+30 }
 0x239   :  { %v214_v26 = vsel %vm205_vm6, %v213_v24, -inf  ;;  %v206_v27 = vsel %vm205_vm6, %v204_v25, -inf }
 0x23a   :  { %215 = vmax.xlane.f32.xlu1 %v214_v26  ;;  %207 = vmax.xlane.f32.xlu0 %v206_v27 }
 0x2c7   :  { %v216_v28 = vpop.xlane.xlu1 %215  ;;  %v208_v29 = vpop.xlane.xlu0 %207 }
 0x2c8   :  { %v217_v30 = vmul.f32 %v216_v28, %v211_v18  ;;  %v209_v31 = vmul.f32 %v208_v29, %v202_v19 }
 0x2ca   :  { %v218_v32 = vadd.f32 %v217_v30, %v209_v31 }
 0x2cc   :  { %v219_v33 = vsub.f32 %v198_v22, %v218_v32 }
 0x2ce   :  { %v220_v34 = vmin.f32 %v219_v33, 0.0 }
 0x2d0   :  { %v221_v35 = vmul.f32 1.442695, %v220_v34 }
 0x2d2   :  { %263 = vpow2.f32 %v221_v35 }
 0x2dc   :  { %v264_v39 = vpop.eup %263 }
 0x2dd   :  { %v226_v41 = vrot.slane %v264_v39, %v225_v38 }
 0x2df   :  { %v228_v42 = vmul.f32 %v227_v40, %v226_v41 }
 0x2e1   :  { %229 = vadd.xlane.f32.xlu0 %v228_v42 }
 0x36e   :  { %v230_v43 = vpop.xlane.xlu0 %229 }
 0x36f   :  { %232 = vst.msk [vmem:[%s339_s5] sm:$0xff] %vm231_vm7, %v230_v43 }

</bundles_post_ra>
